<compile_context>
chip_gen: v7x
topology: tpu7x:2x2x1
jax: 0.10.0
libtpu: 0.0.40
codegen_flags: <defaults>
</compile_context>

<pallas_src>
import functools

import jax
import jax.numpy as jnp
from jax.experimental import pallas as pl
from jax.experimental.pallas import tpu as pltpu

_LANE = 128      # lane width: every feature dim padded to a multiple of this
_SUBLANE = 8     # f32 sublane granularity


def _round_up(x: int, m: int) -> int:
    return (x + m - 1) // m * m


def _cdiv(a: int, b: int) -> int:
    return (a + b - 1) // b


@functools.lru_cache(maxsize=None)
def _vmem_capacity_bytes() -> int:
    """Physical VMEM per TensorCore (128 MiB v5e/v6e, 64 MiB v7x)."""
    try:
        cap = getattr(pltpu.get_tpu_info(), "vmem_capacity_bytes", None)
        if cap:
            return int(cap)
    except Exception:
        pass
    return 64 * 1024 * 1024          # conservative fallback (v7x-sized)


@functools.lru_cache(maxsize=None)
def _single_buffer_supported() -> bool:
    """Probe whether pipeline_mode=pl.Buffered(1) lowers on this Pallas/TPU."""
    try:
        def k(x_ref, o_ref):
            o_ref[...] = x_ref[...] + 1.0

        out = pl.pallas_call(
            k,
            out_shape=jax.ShapeDtypeStruct((8, 128), jnp.float32),
            grid=(2,),
            in_specs=[pl.BlockSpec((8, 128), lambda i: (0, 0),
                                   pipeline_mode=pl.Buffered(1))],
            out_specs=pl.BlockSpec((8, 128), lambda i: (0, 0)),
        )(jnp.zeros((8, 128), jnp.float32))
        jax.block_until_ready(out)
        return True
    except Exception:
        return False


# ---------------------------------------------------------------------------
# Fused whole-MLP kernel: one pallas_call, grid over batch row-tiles only.
# refs = (x_tile, w0, b0, w1, b1, ..., out_tile)
# ---------------------------------------------------------------------------
def _fused_mlp_kernel(*refs, num_layers: int, sigmoid_output: bool):
    x_ref = refs[0]
    o_ref = refs[-1]
    wb = refs[1:-1]
    h = x_ref[...]
    for l in range(num_layers):
        w_ref = wb[2 * l]
        b_ref = wb[2 * l + 1]
        # bf16 (or f32) operands on the MXU, f32 accumulate; bias is f32.
        h = jnp.dot(h.astype(w_ref.dtype), w_ref[...],
                    preferred_element_type=jnp.float32)
        h = h + b_ref[...]
        if l < num_layers - 1:
            h = jnp.maximum(h, 0.0)
        elif sigmoid_output:
            # pad region becomes 0.5 here; harmless, sliced off by the wrapper.
            h = jax.nn.sigmoid(h)
    o_ref[...] = h.astype(o_ref.dtype)


def fused_mlp(xp, weights_p, biases_p, *, sigmoid_output: bool, tm: int,
              vmem_limit: int, single_buffer: bool):
    """xp: (Mp, Kp0) padded input.  weights_p[l]: (Kp_l, Np_l) padded,
    biases_p[l]: (1, Np_l) f32.  Returns (Mp, Np_last) padded output."""
    Mp, Kp0 = xp.shape
    num_layers = len(weights_p)
    Np_last = weights_p[-1].shape[1]

    # Weights/biases have constant block indices -> single-buffer them.
    resident_kw = {"pipeline_mode": pl.Buffered(1)} if single_buffer else {}

    in_specs = [pl.BlockSpec((tm, Kp0), lambda i: (i, 0))]
    flat_args = [xp]
    for w, b in zip(weights_p, biases_p):
        kp, np_ = w.shape
        in_specs.append(pl.BlockSpec((kp, np_), lambda i: (0, 0), **resident_kw))
        in_specs.append(pl.BlockSpec((1, np_), lambda i: (0, 0), **resident_kw))
        flat_args += [w, b]

    kernel = functools.partial(_fused_mlp_kernel,
                               num_layers=num_layers,
                               sigmoid_output=sigmoid_output)
    return pl.pallas_call(
        kernel,
        out_shape=jax.ShapeDtypeStruct((Mp, Np_last), xp.dtype),
        grid_spec=pltpu.PrefetchScalarGridSpec(
            num_scalar_prefetch=0,
            grid=(Mp // tm,),
            in_specs=in_specs,
            out_specs=pl.BlockSpec((tm, Np_last), lambda i: (i, 0)),
        ),
        compiler_params=pltpu.CompilerParams(
            dimension_semantics=("parallel",),   # shards row tiles across v7x's 2 TCs
            vmem_limit_bytes=vmem_limit,
        ),
    )(*flat_args)


# ---------------------------------------------------------------------------
# Fallback: one kernel per layer, tiled over (M, N, K) with an f32 accumulator.
# Used only when the padded weight stack cannot stay resident in VMEM.
# ---------------------------------------------------------------------------
def _linear_act_kernel(x_ref, w_ref, b_ref, o_ref, acc_ref, *, activation: str):
    @pl.when(pl.program_id(2) == 0)
    def _init():
        acc_ref[...] = jnp.zeros_like(acc_ref)

    acc_ref[...] += jnp.dot(x_ref[...], w_ref[...],
                            preferred_element_type=jnp.float32)

    @pl.when(pl.program_id(2) == pl.num_programs(2) - 1)
    def _finalize():
        acc = acc_ref[...] + b_ref[...]
        if activation == "relu":
            acc = jnp.maximum(acc, 0.0)
        elif activation == "sigmoid":
            acc = jax.nn.sigmoid(acc)
        o_ref[...] = acc.astype(o_ref.dtype)


def _fallback_step_bytes(tm, tk, tn, itemsize):
    # double-buffered x / w / bias blocks + f32 accumulator + double-buffered out
    return (2 * (tm * tk + tk * tn) * itemsize + 2 * tn * 4
            + tm * tn * 4 + 2 * tm * tn * itemsize)


def linear_act(xp, wp, bp, activation: str, *, tm: int, vmem_limit: int):
    """xp: (Mp, Kp), wp: (Kp, Np), bp: (1, Np) f32.  Dims pre-padded to 128."""
    Mp, Kp = xp.shape
    _, Np = wp.shape
    isz = jnp.dtype(xp.dtype).itemsize

    tn = 256 if Np % 256 == 0 else _LANE

    # K-reduction tile: largest 128-multiple divisor of Kp whose per-step
    # working set fits comfortably inside the VMEM limit.
    step_budget = vmem_limit // 2
    divisors = [d for d in range(_LANE, Kp + 1, _LANE) if Kp % d == 0]
    tk = divisors[0]
    for d in sorted(divisors, reverse=True):
        if _fallback_step_bytes(tm, d, tn, isz) <= step_budget:
            tk = d
            break

    n_m, n_n, n_k = Mp // tm, Np // tn, Kp // tk

    # Keep the bigger operand's block resident across the inner sweep.
    weight_resident = Kp * Np >= Mp * Kp
    if weight_resident:
        grid = (n_n, n_m, n_k)
        x_map = lambda j, i, k: (i, k)
        w_map = lambda j, i, k: (k, j)
        b_map = lambda j, i, k: (0, j)
        o_map = lambda j, i, k: (i, j)
    else:
        grid = (n_m, n_n, n_k)
        x_map = lambda i, j, k: (i, k)
        w_map = lambda i, j, k: (k, j)
        b_map = lambda i, j, k: (0, j)
        o_map = lambda i, j, k: (i, j)

    kernel = functools.partial(_linear_act_kernel, activation=activation)
    return pl.pallas_call(
        kernel,
        out_shape=jax.ShapeDtypeStruct((Mp, Np), xp.dtype),
        grid_spec=pltpu.PrefetchScalarGridSpec(
            num_scalar_prefetch=0,
            grid=grid,
            in_specs=[
                pl.BlockSpec((tm, tk), x_map),
                pl.BlockSpec((tk, tn), w_map),
                pl.BlockSpec((1, tn), b_map),
            ],
            out_specs=pl.BlockSpec((tm, tn), o_map),
            scratch_shapes=[pltpu.VMEM((tm, tn), jnp.float32)],
        ),
        compiler_params=pltpu.CompilerParams(
            dimension_semantics=("parallel", "parallel", "arbitrary"),
            vmem_limit_bytes=vmem_limit,
        ),
    )(xp, wp, bp)


# ---------------------------------------------------------------------------
# Module mirror
# ---------------------------------------------------------------------------
class MLPPallas:
    """Mirror of the PyTorch MLP module, with deterministic synthetic params."""

    def __init__(self, input_dim, hidden_dim, output_dim, num_layers,
                 sigmoid_output=False, seed=0, dtype=jnp.bfloat16):
        self.num_layers = num_layers
        self.sigmoid_output = sigmoid_output
        self.input_dim = input_dim
        self.output_dim = output_dim
        self.dtype = jnp.dtype(dtype)

        h = [hidden_dim] * (num_layers - 1)
        dims_in = [input_dim] + h
        dims_out = h + [output_dim]

        key = jax.random.PRNGKey(seed)
        self.params = []          # un-padded f32 (w, b) for the reference
        self.params_padded = []   # lane-padded, dtype-cast once at init
        for n, k in zip(dims_in, dims_out):
            key, kw, kb = jax.random.split(key, 3)
            # PyTorch Linear default init: U(-1/sqrt(n), 1/sqrt(n))
            bound = 1.0 / (n ** 0.5)
            w = jax.random.uniform(kw, (n, k), jnp.float32, -bound, bound)
            b = jax.random.uniform(kb, (k,), jnp.float32, -bound, bound)
            self.params.append((w, b))

            kp, np_ = _round_up(n, _LANE), _round_up(k, _LANE)
            # TODO(synk): on v7x, store weights as fp8 with per-output-channel
            # scales folded into the bias path to halve resident VMEM again.
            wp = jnp.zeros((kp, np_), self.dtype).at[:n, :k].set(w.astype(self.dtype))
            bp = jnp.zeros((1, np_), jnp.float32).at[0, :k].set(b)
            self.params_padded.append((wp, bp))

        # Generation-aware VMEM budgets (128 MiB v5e/v6e, 64 MiB v7x).
        cap = _vmem_capacity_bytes()
        self._vmem_limit = int(cap * 0.85)
        self._fused_budget = int(self._vmem_limit * 0.75)
        self._single_buf = _single_buffer_supported()

        # Row-tile alignment: 8 rows for f32, 16 for bf16 (packed sublanes).
        self._row_align = _SUBLANE * max(1, 4 // self.dtype.itemsize)

        self._forward_jit = jax.jit(self._forward, static_argnums=(1, 2))

    # ---- VMEM footprint / tiling heuristics --------------------------------
    def _fused_footprint_bytes(self, tm):
        isz = self.dtype.itemsize
        wfac = 1 if self._single_buf else 2      # Buffered(1) vs default double-buffer
        wb = sum(w.size * w.dtype.itemsize + b.size * b.dtype.itemsize
                 for w, b in self.params_padded) * wfac
        Kp0 = self.params_padded[0][0].shape[0]
        Np_last = self.params_padded[-1][0].shape[1]
        max_np = max(w.shape[1] for w, _ in self.params_padded)
        io = 2 * tm * (Kp0 + Np_last) * isz      # double-buffered x / out row tiles
        inter = 3 * tm * max_np * 4              # live f32 intermediates + casts
        return wb + io + inter

    def _pick_tm(self, M):
        align = self._row_align
        if M <= 256:
            return _round_up(max(M, 1), align)
        # >=2 row tiles keeps both v7x TensorCores busy; tiles up to 512 hit
        # ~85% of HBM roofline and avoid heavy over-padding for ragged M.
        tm = min(512, _round_up(_cdiv(M, 2), align))
        while (tm > 128
               and self._fused_footprint_bytes(tm) > self._fused_budget
               and self._fused_footprint_bytes(_round_up(tm // 2, align))
                   <= self._fused_budget):
            tm = _round_up(tm // 2, align)
        return tm

    # ---- forward ------------------------------------------------------------
    def _forward(self, x, tm, use_fused):
        M, K = x.shape
        Mp = _round_up(M, tm)
        Kp0 = self.params_padded[0][0].shape[0]
        # TODO(synk): handle the ragged last row tile in-kernel (masked partial
        # tile) instead of padding; with tm adapted to M the waste is small.
        xp = jnp.zeros((Mp, Kp0), self.dtype).at[:M, :K].set(x.astype(self.dtype))

        if use_fused:
            weights = [w for w, _ in self.params_padded]
            biases = [b for _, b in self.params_padded]
            out = fused_mlp(xp, weights, biases,
                            sigmoid_output=self.sigmoid_output, tm=tm,
                            vmem_limit=self._vmem_limit,
                            single_buffer=self._single_buf)
        else:
            h = xp
            for i, (wp, bp) in enumerate(self.params_padded):
                if i < self.num_layers - 1:
                    act = "relu"
                else:
                    act = "sigmoid" if self.sigmoid_output else "none"
                h = linear_act(h, wp, bp, act, tm=tm, vmem_limit=self._vmem_limit)
            out = h

        return out[:M, :self.output_dim].astype(x.dtype)

    def __call__(self, x, use_fused=None):
        M, K = x.shape
        assert K == self.input_dim
        tm = self._pick_tm(M)
        if use_fused is None:
            use_fused = self._fused_footprint_bytes(tm) <= self._fused_budget
        return self._forward_jit(x, tm, bool(use_fused))

    def reference(self, x):
        """Plain-JAX f32 reference for correctness checking."""
        h = x
        for i, (w, b) in enumerate(self.params):
            h = h @ w + b
            if i < self.num_layers - 1:
                h = jnp.maximum(h, 0.0)
        if self.sigmoid_output:
            h = jax.nn.sigmoid(h)
        return h


if __name__ == "__main__":
    batch = 8
    input_dim = 16
    hidden_dim = 32
    output_dim = 8
    num_layers = 3

    key = jax.random.PRNGKey(0)
    x = jax.random.normal(key, (batch, input_dim), jnp.float32)

    # Default bf16 compute path (bf16-native MXU, half HBM traffic).
    mlp_bf16 = MLPPallas(input_dim, hidden_dim, output_dim, num_layers,
                         sigmoid_output=True, seed=0)
    ref = mlp_bf16.reference(x)

    out_fused = jax.block_until_ready(mlp_bf16(x, use_fused=True))
    assert out_fused.shape == (batch, output_dim)
    assert jnp.allclose(out_fused, ref, atol=3e-2, rtol=3e-2), "bf16 fused mismatch"

    out_tiled = jax.block_until_ready(mlp_bf16(x, use_fused=False))
    assert jnp.allclose(out_tiled, ref, atol=3e-2, rtol=3e-2), "bf16 tiled mismatch"

    # f32 compute path: tight check against the plain-JAX reference.
    mlp_f32 = MLPPallas(input_dim, hidden_dim, output_dim, num_layers,
                        sigmoid_output=True, seed=0, dtype=jnp.float32)
    ref32 = mlp_f32.reference(x)
    out32 = jax.block_until_ready(mlp_f32(x, use_fused=True))
    assert jnp.allclose(out32, ref32, atol=1e-5, rtol=1e-5), "f32 fused mismatch"

    print("KERNEL_OK")
</pallas_src>

<mosaic_0001>
module attributes {stable_mosaic.version = 11 : i64} {
  func.func @k(%arg0: i32, %arg1: memref<8x128xf32, #tpu.memory_space<vmem>>, %arg2: memref<8x128xf32, #tpu.memory_space<vmem>>) attributes {dimension_semantics = [#tpu.dimension_semantics<arbitrary>], iteration_bounds = array<i64: 2>, scalar_prefetch = 0 : i64, scratch_operands = 0 : i64, tpu.core_type = #tpu.core_type<tc>, window_params = [{pipeline_mode = #tpu.pipeline_mode<synchronous>, transform_indices = @transform_0, window_bounds = array<i64: 8, 128>}, {pipeline_mode = #tpu.pipeline_mode<synchronous>, transform_indices = @transform_1, window_bounds = array<i64: 8, 128>}]} {
    %c0 = arith.constant 0 : index
    %c0_0 = arith.constant 0 : index
    %0 = vector.load %arg1[%c0, %c0_0] : memref<8x128xf32, #tpu.memory_space<vmem>>, vector<8x128xf32>
    %cst = arith.constant 1.000000e+00 : f32
    %1 = vector.broadcast %cst : f32 to vector<8x128xf32>
    %2 = arith.addf %0, %1 : vector<8x128xf32>
    %c0_1 = arith.constant 0 : index
    %c0_2 = arith.constant 0 : index
    %3 = vector.load %arg2[%c0_1, %c0_2] : memref<8x128xf32, #tpu.memory_space<vmem>>, vector<8x128xf32>
    tpu.vector_store %arg2[%c0_1, %c0_2], %2 {strides = array<i32>} : memref<8x128xf32, #tpu.memory_space<vmem>>, vector<8x128xf32>,
    return
  }
  func.func @transform_0(%arg0: i32) -> (i32, i32) {
    %c0_i32 = arith.constant 0 : i32
    %c0_i32_0 = arith.constant 0 : i32
    %c0_i32_1 = arith.constant 0 : i32
    return %c0_i32, %c0_i32_0 : i32, i32
  }
  func.func @transform_1(%arg0: i32) -> (i32, i32) {
    %c0_i32 = arith.constant 0 : i32
    %c0_i32_0 = arith.constant 0 : i32
    %c0_i32_1 = arith.constant 0 : i32
    return %c0_i32, %c0_i32_0 : i32, i32
  }
}

module attributes {stable_mosaic.version = 11 : i64} {
  func.func @_fused_mlp_kernel(%arg0: i32, %arg1: memref<16x128xbf16, #tpu.memory_space<vmem>>, %arg2: memref<128x128xbf16, #tpu.memory_space<vmem>>, %arg3: memref<1x128xf32, #tpu.memory_space<vmem>>, %arg4: memref<128x128xbf16, #tpu.memory_space<vmem>>, %arg5: memref<1x128xf32, #tpu.memory_space<vmem>>, %arg6: memref<128x128xbf16, #tpu.memory_space<vmem>>, %arg7: memref<1x128xf32, #tpu.memory_space<vmem>>, %arg8: memref<16x128xbf16, #tpu.memory_space<vmem>>) attributes {dimension_semantics = [#tpu.dimension_semantics<parallel>], iteration_bounds = array<i64: 1>, scalar_prefetch = 0 : i64, scratch_operands = 0 : i64, tpu.core_type = #tpu.core_type<tc>, window_params = [{transform_indices = @transform_0, window_bounds = array<i64: 16, 128>}, {pipeline_mode = #tpu.pipeline_mode<synchronous>, transform_indices = @transform_1, window_bounds = array<i64: 128, 128>}, {pipeline_mode = #tpu.pipeline_mode<synchronous>, transform_indices = @transform_2, window_bounds = array<i64: 1, 128>}, {pipeline_mode = #tpu.pipeline_mode<synchronous>, transform_indices = @transform_3, window_bounds = array<i64: 128, 128>}, {pipeline_mode = #tpu.pipeline_mode<synchronous>, transform_indices = @transform_4, window_bounds = array<i64: 1, 128>}, {pipeline_mode = #tpu.pipeline_mode<synchronous>, transform_indices = @transform_5, window_bounds = array<i64: 128, 128>}, {pipeline_mode = #tpu.pipeline_mode<synchronous>, transform_indices = @transform_6, window_bounds = array<i64: 1, 128>}, {transform_indices = @transform_7, window_bounds = array<i64: 16, 128>}]} {
    %c0 = arith.constant 0 : index
    %c0_0 = arith.constant 0 : index
    %0 = vector.load %arg1[%c0, %c0_0] : memref<16x128xbf16, #tpu.memory_space<vmem>>, vector<16x128xbf16>
    %c0_1 = arith.constant 0 : index
    %c0_2 = arith.constant 0 : index
    %1 = vector.load %arg2[%c0_1, %c0_2] : memref<128x128xbf16, #tpu.memory_space<vmem>>, vector<128x128xbf16>
    %cst = arith.constant dense<0.000000e+00> : vector<16x128xf32>
    %2 = tpu.matmul %0, %1, %cst {dimension_numbers = #tpu.dot_dimension_numbers<[1], [0], [0], [1], [0, 0, 1, 1], [], []>} : vector<16x128xbf16>, vector<128x128xbf16>, vector<16x128xf32> -> vector<16x128xf32>
    %c0_3 = arith.constant 0 : index
    %c0_4 = arith.constant 0 : index
    %3 = vector.load %arg3[%c0_3, %c0_4] : memref<1x128xf32, #tpu.memory_space<vmem>>, vector<1x128xf32>
    %4 = vector.broadcast %3 : vector<1x128xf32> to vector<16x128xf32>
    %5 = arith.addf %2, %4 : vector<16x128xf32>
    %cst_5 = arith.constant 0.000000e+00 : f32
    %6 = vector.broadcast %cst_5 : f32 to vector<16x128xf32>
    %7 = arith.maximumf %5, %6 : vector<16x128xf32>
    %8 = arith.truncf %7 : vector<16x128xf32> to vector<16x128xbf16>
    %c0_6 = arith.constant 0 : index
    %c0_7 = arith.constant 0 : index
    %9 = vector.load %arg4[%c0_6, %c0_7] : memref<128x128xbf16, #tpu.memory_space<vmem>>, vector<128x128xbf16>
    %cst_8 = arith.constant dense<0.000000e+00> : vector<16x128xf32>
    %10 = tpu.matmul %8, %9, %cst_8 {dimension_numbers = #tpu.dot_dimension_numbers<[1], [0], [0], [1], [0, 0, 1, 1], [], []>} : vector<16x128xbf16>, vector<128x128xbf16>, vector<16x128xf32> -> vector<16x128xf32>
    %c0_9 = arith.constant 0 : index
    %c0_10 = arith.constant 0 : index
    %11 = vector.load %arg5[%c0_9, %c0_10] : memref<1x128xf32, #tpu.memory_space<vmem>>, vector<1x128xf32>
    %12 = vector.broadcast %11 : vector<1x128xf32> to vector<16x128xf32>
    %13 = arith.addf %10, %12 : vector<16x128xf32>
    %cst_11 = arith.constant 0.000000e+00 : f32
    %14 = vector.broadcast %cst_11 : f32 to vector<16x128xf32>
    %15 = arith.maximumf %13, %14 : vector<16x128xf32>
    %16 = arith.truncf %15 : vector<16x128xf32> to vector<16x128xbf16>
    %c0_12 = arith.constant 0 : index
    %c0_13 = arith.constant 0 : index
    %17 = vector.load %arg6[%c0_12, %c0_13] : memref<128x128xbf16, #tpu.memory_space<vmem>>, vector<128x128xbf16>
    %cst_14 = arith.constant dense<0.000000e+00> : vector<16x128xf32>
    %18 = tpu.matmul %16, %17, %cst_14 {dimension_numbers = #tpu.dot_dimension_numbers<[1], [0], [0], [1], [0, 0, 1, 1], [], []>} : vector<16x128xbf16>, vector<128x128xbf16>, vector<16x128xf32> -> vector<16x128xf32>
    %c0_15 = arith.constant 0 : index
    %c0_16 = arith.constant 0 : index
    %19 = vector.load %arg7[%c0_15, %c0_16] : memref<1x128xf32, #tpu.memory_space<vmem>>, vector<1x128xf32>
    %20 = vector.broadcast %19 : vector<1x128xf32> to vector<16x128xf32>
    %21 = arith.addf %18, %20 : vector<16x128xf32>
    %22 = arith.negf %21 : vector<16x128xf32>
    %23 = math.exp %22 : vector<16x128xf32>
    %cst_17 = arith.constant 1.000000e+00 : f32
    %24 = vector.broadcast %cst_17 : f32 to vector<16x128xf32>
    %25 = arith.addf %24, %23 : vector<16x128xf32>
    %26 = arith.divf %24, %25 : vector<16x128xf32>
    %27 = arith.truncf %26 : vector<16x128xf32> to vector<16x128xbf16>
    %c0_18 = arith.constant 0 : index
    %c0_19 = arith.constant 0 : index
    %28 = vector.load %arg8[%c0_18, %c0_19] : memref<16x128xbf16, #tpu.memory_space<vmem>>, vector<16x128xbf16>
    tpu.vector_store %arg8[%c0_18, %c0_19], %27 {strides = array<i32>} : memref<16x128xbf16, #tpu.memory_space<vmem>>, vector<16x128xbf16>,
    return
  }
  func.func @transform_0(%arg0: i32) -> (i32, i32) {
    %c0_i32 = arith.constant 0 : i32
    %c0_i32_0 = arith.constant 0 : i32
    return %arg0, %c0_i32 : i32, i32
  }
  func.func @transform_1(%arg0: i32) -> (i32, i32) {
    %c0_i32 = arith.constant 0 : i32
    %c0_i32_0 = arith.constant 0 : i32
    %c0_i32_1 = arith.constant 0 : i32
    return %c0_i32, %c0_i32_0 : i32, i32
  }
  func.func @transform_2(%arg0: i32) -> (i32, i32) {
    %c0_i32 = arith.constant 0 : i32
    %c0_i32_0 = arith.constant 0 : i32
    %c0_i32_1 = arith.constant 0 : i32
    return %c0_i32, %c0_i32_0 : i32, i32
  }
  func.func @transform_3(%arg0: i32) -> (i32, i32) {
    %c0_i32 = arith.constant 0 : i32
    %c0_i32_0 = arith.constant 0 : i32
    %c0_i32_1 = arith.constant 0 : i32
    return %c0_i32, %c0_i32_0 : i32, i32
  }
  func.func @transform_4(%arg0: i32) -> (i32, i32) {
    %c0_i32 = arith.constant 0 : i32
    %c0_i32_0 = arith.constant 0 : i32
    %c0_i32_1 = arith.constant 0 : i32
    return %c0_i32, %c0_i32_0 : i32, i32
  }
  func.func @transform_5(%arg0: i32) -> (i32, i32) {
    %c0_i32 = arith.constant 0 : i32
    %c0_i32_0 = arith.constant 0 : i32
    %c0_i32_1 = arith.constant 0 : i32
    return %c0_i32, %c0_i32_0 : i32, i32
  }
  func.func @transform_6(%arg0: i32) -> (i32, i32) {
    %c0_i32 = arith.constant 0 : i32
    %c0_i32_0 = arith.constant 0 : i32
    %c0_i32_1 = arith.constant 0 : i32
    return %c0_i32, %c0_i32_0 : i32, i32
  }
  func.func @transform_7(%arg0: i32) -> (i32, i32) {
    %c0_i32 = arith.constant 0 : i32
    %c0_i32_0 = arith.constant 0 : i32
    return %arg0, %c0_i32 : i32, i32
  }
}

</mosaic_0001>

<bundles_post_ra>
// kernel: tpu_custom_call.1
= control target key start
LH: loop header
LB: loop body
LE: loop exit
PB: predicated region body
PF: predicated region fallthrough
CT: control target
= control target key end

     0   :  { %6 = vsyncpa [#allocation3], 0  ;;  %s341_s0 = inlined_call_operand.hbm [shape: f32[8,128], index: 0, kind: input, shape index: {}]   ;;  %s342_s1 = inlined_call_operand.hbm [shape: f32[8,128], index: 1, kind: output, shape index: {}]  }
   0x1   :  { %7 = vsyncpa [#allocation4], 0  ;;  %s262_s6 = smov 0  }
   0x2 LB: > { %s145_s7 = sadd.s32 4294967295, %s248_s6   ;;  %p146_p0 = scmp.ge.s32.totalorder %s248_s6, 1  ;;  %s248_s6 = sphi %s262_s6, %s13_s6  }
   0x3   : > { %p60_p1 = scmp.lt.s32.totalorder %s248_s6, 3  ;;  %p276_p3 = scmp.eq.s32.totalorder %s145_s7, 0 }
   0x4   : > { %s250_s10 = smov [#allocation2]   ;;  %s180_s15 = scalar_lea.hbm %s341_s0, 128 }
   0x5   : > { %p270_p2 = pnand %p146_p0, %p60_p1  ;;  %s73_s11 = sshll.u32 %s250_s10, 4  ;;  %s74_s11 = int_to_ptr.vmem [resolvable:$true] %s73_s11 }
   0x6   : > { %s347_s9 = scalar_select %p276_p3, 1, 0 }
   0x7   : > { %s346_s8 = scalar_select %p270_p2, 1, 0 }
   0x8   : > { %p162_p4 = pneg %p270_p2  ;;  %p181_p6 = scmp.ne.s32.totalorder %s341_s0, %s180_s15 }
   0x9   : > { %p187_p10 = scmp.lt.u32.totalorder %s180_s15, %s341_s0 }
   0xa   : > { %p284_p5 = pnand %p276_p3, %p162_p4 }
   0xc   : > { %p182_p7 = pneg %p284_p5 }
   0xe   : > { %p183_p8 = pnand %p182_p7, %p181_p6 }
  0x10   : > { %p184_p9 = pneg %p183_p8 }
  0x12   : > { %p189_p11 = pnand %p187_p10, %p184_p9 }
  0x14   : > { %192 = shalt.err (!%p189_p11)
}
  0x15   : > { %s193_s20 = scalar_lea.vmem %s74_s11, 128  ;;  %p201_p1 = scmp.lt.s32.totalorder %s74_s11, %s74_s11 }
  0x16   : > { %p194_p12 = scmp.ne.s32.totalorder %s74_s11, %s193_s20  ;;  %p202_p4 = scmp.lt.s32.totalorder %s193_s20, %s193_s20 }
  0x18   : > { %p196_p13 = pnand %p194_p12, %p182_p7  ;;  %p203_p3 = por %p202_p4, %p201_p1 }
  0x1a   : > { %p197_p0 = pneg %p196_p13 }
  0x1c   : > { %p204_p2 = pnand %p203_p3, %p197_p0 }
  0x1e   : > { %207 = shalt.err (!%p204_p2)
}
  0x1f   : > { %165 = dma.hbm_to_vmem [thread:$0]  (!%p284_p5), %s341_s0, 128, %s74_s11, [#allocation3]  }
  0x20   : > { %p349_p6 = scmp.ne.s32.totalorder %s346_s8, 0 }
  0x21   : > { %p350_p8 = scmp.ne.s32.totalorder (!%p349_p6), %s347_s9, 0 }
  0x22   : > { %86 = sbr.rel (%p349_p6) target bundleno = 67 (0x43), region = 24 }
  0x29   : > { %239 = dma.done.wait (%p350_p8), [#allocation3], 128  }
  0x2a   : > { %241 = vsyncadd (%p350_p8), [#allocation3], 4294967168  ;;  %s251_s23 = smov [#allocation5]   ;;  %v96_v0 = vld [vmem:[#allocation2] sm:$0xff]  ;;  %p312_p2 = scmp.eq.s32.totalorder %s145_s7, 1 }
  0x2b   : > { %s106_s24 = sshll.u32 %s251_s23, 4  ;;  %v97_v1 = vadd.f32 1.0, %v96_v0  ;;  %s107_s24 = int_to_ptr.vmem [resolvable:$true] %s106_s24 }
  0x2c   : > { %s208_s26 = scalar_lea.vmem %s107_s24, 128  ;;  %p215_p9 = scmp.lt.s32.totalorder %s107_s24, %s107_s24 }
  0x2d   : > { %98 = vst [vmem:[#allocation5] sm:$0xff] %v97_v1  ;;  %p209_p3 = scmp.ne.s32.totalorder %s107_s24, %s208_s26  ;;  %p216_p10 = scmp.lt.s32.totalorder %s208_s26, %s208_s26 }
  0x2f   : > { %p210_p5 = pnand %p209_p3, %p312_p2  ;;  %p217_p11 = por %p216_p10, %p215_p9 }
  0x31   : > { %p211_p7 = pneg %p210_p5 }
  0x33   : > { %p218_p12 = pnand %p217_p11, %p211_p7 }
  0x35   : > { %221 = shalt.err (!%p218_p12)
}
  0x36   : > { %s222_s29 = scalar_lea.hbm %s342_s1, 128 }
  0x37   : > { %p223_p13 = scmp.ne.s32.totalorder %s342_s1, %s222_s29  ;;  %p228_p4 = scmp.lt.u32.totalorder %s222_s29, %s342_s1 }
  0x39   : > { %p224_p0 = pnand %p223_p13, %p312_p2 }
  0x3b   : > { %p225_p1 = pneg %p224_p0 }
  0x3d   : > { %p230_p6 = pnand %p228_p4, %p225_p1 }
  0x3f   : > { %233 = shalt.err (!%p230_p6)
}
  0x40   : > { %159 = dma.vmem_to_hbm [thread:$0]  (%p312_p2), %s107_s24, 128, %s342_s1, [#allocation4]  }
  0x41   : > { %243 = dma.done.wait (%p312_p2), [#allocation4], 128  }
  0x42   : > { %245 = vsyncadd (%p312_p2), [#allocation4], 4294967168 }
  0x43 PF: > { %s13_s6 = sadd.s32 1, %s248_s6  }
  0x44   : > { %p10_p8 = scmp.ge.s32.totalorder %s13_s6, 4  }
  0x46   :  { %12 = sbr.rel (!%p10_p8) target bundleno = 2 (0x2), region = 53 }
  0x4d   :  { %119 = vsyncpa [#allocation3], 1 }
  0x4e   :  { %121 = vsyncpa [#allocation3 + $0x1], 1 }
  0x4f   :  { %122 = vsyncpa [#allocation4], 1 }
  0x50   :  { %124 = vsyncpa [#allocation4 + $0x1], 1 }

// kernel: _forward.1
= control target key start
LH: loop header
LB: loop body
LE: loop exit
PB: predicated region body
PF: predicated region fallthrough
CT: control target
= control target key end

     0   :  { %12 = vsyncpa [#allocation3], 0  ;;  %s826_s0 = inlined_call_operand.vmem [shape: bf16[16,128], index: 0, kind: input, shape index: {}]   ;;  %s827_s1 = inlined_call_operand.hbm [shape: bf16[128,128], index: 1, kind: input, shape index: {}]   ;;  %s828_s2 = inlined_call_operand.vmem [shape: f32[1,128], index: 2, kind: input, shape index: {}]   ;;  %s829_s3 = inlined_call_operand.hbm [shape: bf16[128,128], index: 3, kind: input, shape index: {}]   ;;  %s830_s4 = inlined_call_operand.vmem [shape: f32[1,128], index: 4, kind: input, shape index: {}]   ;;  %s831_s5 = inlined_call_operand.hbm [shape: bf16[128,128], index: 5, kind: input, shape index: {}]   ;;  %s832_s6 = inlined_call_operand.vmem [shape: f32[1,128], index: 6, kind: input, shape index: {}]   ;;  %s833_s7 = inlined_call_operand.vmem [shape: bf16[16,128], index: 7, kind: output, shape index: {}]  }
   0x1   :  { %13 = vsyncpa [#allocation5], 0  ;;  %s682_s24 = smov [#allocation4]   ;;  %s683_s26 = smov [#allocation2]  }
   0x2   :  { %s35_s25 = sshll.u32 %s682_s24, 4  ;;  %s21_s27 = sshll.u32 %s683_s26, 4  ;;  %s36_s25 = int_to_ptr.vmem [resolvable:$true] %s35_s25  ;;  %s729_s27 = int_to_ptr.vmem [resolvable:$true] %s21_s27 }
   0x3   :  { %s612_s30 = scalar_lea.hbm %s829_s3, 1024 }
   0x4   :  { %p613_p0 = scmp.ne.s32.totalorder %s829_s3, %s612_s30  ;;  %p616_p1 = scmp.lt.u32.totalorder %s612_s30, %s829_s3 }
   0x6   :  { %p618_p2 = pnand %p616_p1, %p613_p0 }
   0x8   :  { %621 = shalt.err (!%p618_p2)
}
   0x9   :  { %s622_s12 = scalar_lea.vmem %s36_s25, 1024  ;;  %p627_p4 = scmp.lt.s32.totalorder %s36_s25, %s36_s25 }
   0xa   :  { %p623_p3 = scmp.ne.s32.totalorder %s36_s25, %s622_s12  ;;  %p628_p5 = scmp.lt.s32.totalorder %s622_s12, %s622_s12 }
   0xc   :  { %p629_p6 = por %p628_p5, %p627_p4 }
   0xe   :  { %p630_p7 = pnand %p629_p6, %p623_p3 }
  0x10   :  { %633 = shalt.err (!%p630_p7)
}
  0x11   :  { %s684_s13 = smov 64   ;;  %s685_s14 = smov 4  }
  0x12   :  { %41 = dma.hbm_to_vmem [thread:$0]  %s829_s3, 1024, %s36_s25, [#allocation5], %s684_s13, %s684_s13, %s685_s14  }
  0x13   :  { %s634_s19 = scalar_lea.hbm %s827_s1, 1024 }
  0x14   :  { %p635_p8 = scmp.ne.s32.totalorder %s827_s1, %s634_s19  ;;  %p638_p9 = scmp.lt.u32.totalorder %s634_s19, %s827_s1 }
  0x16   :  { %p640_p10 = pnand %p638_p9, %p635_p8 }
  0x18   :  { %643 = shalt.err (!%p640_p10)
}
  0x19   :  { %s644_s24 = scalar_lea.vmem %s729_s27, 1024  ;;  %p649_p12 = scmp.lt.s32.totalorder %s729_s27, %s729_s27 }
  0x1a   :  { %p645_p11 = scmp.ne.s32.totalorder %s729_s27, %s644_s24  ;;  %p650_p13 = scmp.lt.s32.totalorder %s644_s24, %s644_s24 }
  0x1c   :  { %p651_p0 = por %p650_p13, %p649_p12 }
  0x1e   :  { %p652_p1 = pnand %p651_p0, %p645_p11 }
  0x20   :  { %655 = shalt.err (!%p652_p1)
}
  0x21   :  { %27 = dma.hbm_to_vmem [thread:$0]  %s827_s1, 1024, %s729_s27, [#allocation3], %s684_s13, %s684_s13, %s685_s14  }
  0x22   :  { %s686_s26 = smov [#allocation6]   ;;  %s656_s8 = scalar_lea.hbm %s831_s5, 1024 }
  0x23   :  { %s49_s28 = sshll.u32 %s686_s26, 4  ;;  %p657_p2 = scmp.ne.s32.totalorder %s831_s5, %s656_s8  ;;  %s50_s28 = int_to_ptr.vmem [resolvable:$true] %s49_s28 }
  0x24   :  { %p660_p3 = scmp.lt.u32.totalorder %s656_s8, %s831_s5 }
  0x26   :  { %p662_p4 = pnand %p660_p3, %p657_p2 }
  0x28   :  { %665 = shalt.err (!%p662_p4)
}
  0x29   :  { %s666_s15 = scalar_lea.vmem %s50_s28, 1024  ;;  %p671_p6 = scmp.lt.s32.totalorder %s50_s28, %s50_s28 }
  0x2a   :  { %p667_p5 = scmp.ne.s32.totalorder %s50_s28, %s666_s15  ;;  %p672_p7 = scmp.lt.s32.totalorder %s666_s15, %s666_s15 }
  0x2c   :  { %p673_p8 = por %p672_p7, %p671_p6 }
  0x2e   :  { %p674_p9 = pnand %p673_p8, %p667_p5 }
  0x30   :  { %677 = shalt.err (!%p674_p9)
}
  0x31   :  { %55 = dma.hbm_to_vmem [thread:$0]  %s831_s5, 1024, %s50_s28, [#allocation5], %s684_s13, %s684_s13, %s685_s14  }
  0x32   :  { %678 = dma.done.wait [#allocation3], 1024  }
  0x33   :  { %679 = vsyncadd [#allocation3], 4294966272 }
  0x34   :  { %680 = dma.done.wait [#allocation5], 2048  }
  0x35   :  { %681 = vsyncadd [#allocation5], 4294965248  ;;  %v687_v0 = vmov 0.0   ;;  %vm688_vm0 = vmmov 0   ;;  %v579_v1 = vld [vmem:[#allocation2] sm:$0xff]   ;;  %v580_v2 = vld [vmem:[#allocation2 + $0x8] sm:$0xff]  }
  0x36   :  { %512 = vmatprep.subr.bf16.mxu0 %v687_v0  ;;  %528 = vmatprep.mubr.msk.bf16.mxu0 %vm688_vm0, %v687_v0  ;;  %v581_v3 = vld [vmem:[#allocation2 + $0x10] sm:$0xff]   ;;  %v588_v4 = vld [vmem:[#allocation4] sm:$0xff]   ;;  %v582_v5 = vld [vmem:[#allocation2 + $0x18] sm:$0xff]  }
  0x37   :  { %532 = vmatprep.subr.bf16.mxu1 %v687_v0  ;;  %548 = vmatprep.mubr.msk.bf16.mxu1 %vm688_vm0, %v687_v0  ;;  %v589_v6 = vld [vmem:[#allocation4 + $0x8] sm:$0xff]   ;;  %v583_v7 = vld [vmem:[#allocation2 + $0x20] sm:$0xff]   ;;  %v590_v8 = vld [vmem:[#allocation4 + $0x10] sm:$0xff]  }
  0x38   :  { %513 = vmatpush3.bf16.msra.mxu0 %v579_v1  ;;  %533 = vmatpush3.bf16.msra.mxu1 %v588_v4  ;;  %v584_v9 = vld [vmem:[#allocation2 + $0x28] sm:$0xff]   ;;  %v591_v10 = vld [vmem:[#allocation4 + $0x18] sm:$0xff]   ;;  %v585_v11 = vld [vmem:[#allocation2 + $0x30] sm:$0xff]  }
  0x39   :  { %514 = vmatprep.subr.bf16.mxu0 %v687_v0  ;;  %534 = vmatprep.subr.bf16.mxu1 %v687_v0  ;;  %v592_v12 = vld [vmem:[#allocation4 + $0x20] sm:$0xff]   ;;  %v586_v13 = vld [vmem:[#allocation2 + $0x38] sm:$0xff]   ;;  %v593_v14 = vld [vmem:[#allocation4 + $0x28] sm:$0xff]  }
  0x3a   :  { %v587_v15 = vld [vmem:[%s826_s0] sm:$0xff]   ;;  %v594_v16 = vld [vmem:[#allocation4 + $0x30] sm:$0xff]   ;;  %v595_v17 = vld [vmem:[#allocation4 + $0x38] sm:$0xff]  }
  0x3b   :  { %v596_v18 = vld [vmem:[#allocation6] sm:$0xff]   ;;  %v597_v19 = vld [vmem:[#allocation6 + $0x8] sm:$0xff]   ;;  %v598_v20 = vld [vmem:[#allocation6 + $0x10] sm:$0xff]  }
  0x3c   :  { %515 = vmatpush3.bf16.msra.mxu0 %v580_v2  ;;  %535 = vmatpush3.bf16.msra.mxu1 %v589_v6  ;;  %v599_v21 = vld [vmem:[#allocation6 + $0x18] sm:$0xff]   ;;  %v600_v22 = vld [vmem:[#allocation6 + $0x20] sm:$0xff]   ;;  %v601_v23 = vld [vmem:[#allocation6 + $0x28] sm:$0xff]  }
  0x3d   :  { %516 = vmatprep.subr.bf16.mxu0 %v687_v0  ;;  %536 = vmatprep.subr.bf16.mxu1 %v687_v0  ;;  %v446_v24 = vld [vmem:[%s828_s2] ss:$0 sm:$0xff]  ;;  %v602_v34 = vld [vmem:[#allocation6 + $0x30] sm:$0xff]   ;;  %v603_v35 = vld [vmem:[#allocation6 + $0x38] sm:$0xff]  }
  0x3e   :  { %v456_v36 = vld [vmem:[%s830_s4] ss:$0 sm:$0xff] }
  0x3f   :  { %v465_v46 = vld [vmem:[%s832_s6] ss:$0 sm:$0xff] }
  0x40   :  { %517 = vmatpush3.bf16.msra.mxu0 %v581_v3  ;;  %537 = vmatpush3.bf16.msra.mxu1 %v590_v8 }
  0x41   :  { %518 = vmatprep.subr.bf16.mxu0 %v687_v0  ;;  %538 = vmatprep.subr.bf16.mxu1 %v687_v0 }
  0x44   :  { %519 = vmatpush3.bf16.msra.mxu0 %v582_v5  ;;  %539 = vmatpush3.bf16.msra.mxu1 %v591_v10 }
  0x45   :  { %520 = vmatprep.subr.bf16.mxu0 %v687_v0  ;;  %540 = vmatprep.subr.bf16.mxu1 %v687_v0 }
  0x48   :  { %521 = vmatpush3.bf16.msra.mxu0 %v583_v7  ;;  %541 = vmatpush3.bf16.msra.mxu1 %v592_v12 }
  0x49   :  { %522 = vmatprep.subr.bf16.mxu0 %v687_v0  ;;  %542 = vmatprep.subr.bf16.mxu1 %v687_v0 }
  0x4c   :  { %523 = vmatpush3.bf16.msra.mxu0 %v584_v9  ;;  %543 = vmatpush3.bf16.msra.mxu1 %v593_v14 }
  0x4d   :  { %524 = vmatprep.subr.bf16.mxu0 %v687_v0  ;;  %544 = vmatprep.subr.bf16.mxu1 %v687_v0 }
  0x50   :  { %525 = vmatpush3.bf16.msra.mxu0 %v585_v11  ;;  %545 = vmatpush3.bf16.msra.mxu1 %v594_v16 }
  0x51   :  { %526 = vmatprep.subr.bf16.mxu0 %v687_v0  ;;  %546 = vmatprep.subr.bf16.mxu1 %v687_v0 }
  0x54   :  { %527 = vmatpush3.bf16.msra.mxu0 %v586_v13  ;;  %547 = vmatpush3.bf16.msra.mxu1 %v595_v17 }
  0x55   :  { %552 = vmatprep.subr.bf16.mxu0 %v687_v0 }
  0x57   :  { %529 = vmatmul.mubr.bf16.vlgmr.msra.gmra.mrb[0].mxu0 %v587_v15 }
  0x58   :  { %568 = vmatprep.mubr.msk.bf16.mxu0 %vm688_vm0, %v687_v0  ;;  %553 = vmatpush3.bf16.msra.mxu0 %v596_v18 }
  0x59   :  { %554 = vmatprep.subr.bf16.mxu0 %v687_v0 }
  0x5c   :  { %555 = vmatpush3.bf16.msra.mxu0 %v597_v19 }
  0x5d   :  { %556 = vmatprep.subr.bf16.mxu0 %v687_v0 }
  0x60   :  { %557 = vmatpush3.bf16.msra.mxu0 %v598_v20 }
  0x61   :  { %558 = vmatprep.subr.bf16.mxu0 %v687_v0 }
  0x64   :  { %559 = vmatpush3.bf16.msra.mxu0 %v599_v21 }
  0x65   :  { %560 = vmatprep.subr.bf16.mxu0 %v687_v0 }
  0x68   :  { %561 = vmatpush3.bf16.msra.mxu0 %v600_v22 }
  0x69   :  { %562 = vmatprep.subr.bf16.mxu0 %v687_v0 }
  0x6c   :  { %563 = vmatpush3.bf16.msra.mxu0 %v601_v23 }
  0x6d   :  { %564 = vmatprep.subr.bf16.mxu0 %v687_v0 }
  0x70   :  { %565 = vmatpush3.bf16.msra.mxu0 %v602_v34 }
  0x71   :  { %566 = vmatprep.subr.bf16.mxu0 %v687_v0 }
  0x74   :  { %567 = vmatpush3.bf16.msra.mxu0 %v603_v35 }
 0x12a   :  { %v181_v25 = vpop.f32.mrb[0].mxu0 }
 0x12b   :  { %v182_v26 = vadd.f32 %v446_v24, %v181_v25  ;;  %v530_v27 = vpop.f32.mrb[1].mxu0 }
 0x12c   :  { %v184_v28 = vpop.f32.mrb[2].mxu0 }
 0x12d   :  { %v185_v29 = vadd.f32 %v446_v24, %v184_v28  ;;  %v531_v30 = vpop.f32.mrb[3].mxu0  ;;  %v188_v31 = vmax.f32 %v182_v26, 0.0 }
 0x12f   :  { %v189_v32 = vmax.f32 %v185_v29, 0.0 }
 0x131   :  { %v190_v33 = vpack.c.bf16 %v189_v32, %v188_v31 }
 0x133   :  { %549 = vmatmul.mubr.bf16.vlgmr.msra.gmra.mrb[0].mxu1 %v190_v33 }
 0x206   :  { %v296_v37 = vpop.f32.mrb[0].mxu1 }
 0x207   :  { %v297_v38 = vadd.f32 %v456_v36, %v296_v37  ;;  %v550_v39 = vpop.f32.mrb[1].mxu1 }
 0x208   :  { %v299_v40 = vpop.f32.mrb[2].mxu1 }
 0x209   :  { %v300_v41 = vadd.f32 %v456_v36, %v299_v40  ;;  %v551_v42 = vpop.f32.mrb[3].mxu1  ;;  %v303_v43 = vmax.f32 %v297_v38, 0.0 }
 0x20b   :  { %v304_v44 = vmax.f32 %v300_v41, 0.0 }
 0x20d   :  { %v305_v45 = vpack.c.bf16 %v304_v44, %v303_v43 }
 0x20f   :  { %569 = vmatmul.mubr.bf16.vlgmr.msra.gmra.mrb[4].mxu0 %v305_v45 }
 0x2e2   :  { %v411_v47 = vpop.f32.mrb[4].mxu0 }
 0x2e3   :  { %v412_v48 = vadd.f32 %v465_v46, %v411_v47  ;;  %v570_v49 = vpop.f32.mrb[5].mxu0 }
 0x2e4   :  { %v414_v50 = vpop.f32.mrb[6].mxu0 }
 0x2e5   :  { %v474_v51 = vmul.f32 -1.442695, %v412_v48  ;;  %v415_v52 = vadd.f32 %v465_v46, %v414_v50  ;;  %v571_v53 = vpop.f32.mrb[7].mxu0 }
 0x2e7   :  { %604 = vpow2.f32 %v474_v51  ;;  %v475_v54 = vmul.f32 -1.442695, %v415_v52 }
 0x2e9   :  { %606 = vpow2.f32 %v475_v54 }
 0x2f1   :  { %v605_v55 = vpop.eup %604 }
 0x2f2   :  { %v424_v56 = vadd.f32 1.0, %v605_v55 }
 0x2f3   :  { %v607_v57 = vpop.eup %606 }
 0x2f4   :  { %v425_v58 = vadd.f32 1.0, %v607_v57  ;;  %608 = vrcp.f32 %v424_v56 }
 0x2f6   :  { %610 = vrcp.f32 %v425_v58 }
 0x2fe   :  { %v609_v59 = vpop.eup %608 }
 0x300   :  { %v611_v60 = vpop.eup %610 }
 0x301   :  { %v483_v61 = vpack.c.bf16 %v611_v60, %v609_v59 }
 0x303   :  { %484 = vst [vmem:[%s833_s7] sm:$0xff] %v483_v61  }
 0x304   :  { %444 = vsyncpa [#allocation3], 1 }
 0x305   :  { %445 = vsyncpa [#allocation5], 1 }

</bundles_post_ra>
